<compile_context>
chip_gen: v6e
topology: v6e:2x2x1
jax: 0.10.0
libtpu: 0.0.40
codegen_flags: <defaults>
</compile_context>

<pallas_src>
import functools

import jax
import jax.numpy as jnp
from jax import lax
from jax.experimental import pallas as pl
from jax.experimental.pallas import tpu as pltpu


def _cdiv(a, b):
    return -(-a // b)


def _adain_kernel(x_ref, gb_ref, o_ref, *, n_true):
    # x_ref: (TR, Np) tile (Np may be zero-padded past n_true).
    # gb_ref: (TR, 2) float32 — gamma in col 0, beta in col 1.
    x = x_ref[...].astype(jnp.float32)

    g = gb_ref[:, 0:1]                               # (TR, 1) f32
    b = gb_ref[:, 1:2]                               # (TR, 1) f32

    # One-pass reduction; zero-padded lanes contribute 0 to both sums, so no
    # lane mask is needed — only the true n enters the statistics.
    s1 = jnp.sum(x, axis=-1, keepdims=True)          # (TR, 1)
    s2 = jnp.sum(x * x, axis=-1, keepdims=True)      # (TR, 1)

    mean = s1 * jnp.float32(1.0 / n_true)
    # Unbiased variance (ddof = 1), matching torch.Tensor.std.  n_true == 1
    # divides by zero at runtime (inf/nan), same as the PyTorch module.
    var = (s2 - s1 * mean) / jnp.float32(n_true - 1)

    # Per-row rsqrt on the EUP, folded into gamma; mean folded into beta.
    scale = g * lax.rsqrt(var)                       # (TR, 1)
    shift = b - mean * scale                         # (TR, 1)
    o_ref[...] = (x * scale + shift).astype(o_ref.dtype)


def _vmem_capacity_bytes():
    """Physical VMEM per TensorCore; falls back to the smallest gen (v7x)."""
    try:
        return int(pltpu.get_tpu_info().vmem_capacity_bytes)
    except Exception:
        return 64 << 20


def _choose_tile_rows(R, Np, itemsize, vmem_cap):
    """Sublane-aligned row-tile size for the (R, Np) slab.

    Sized from the f32 *working* footprint (the kernel upcasts the tile to
    f32): ~8 MiB tiles on 64 MiB-VMEM parts (v7x), ~16 MiB on 128 MiB parts
    (v5e/v6e).  Prefers an even grid step count so both v7x TensorCores get
    work, and >= 4 steps once the slab is big enough to keep the DMA pipeline
    busy.
    """
    row_align = max(8, 32 // itemsize)               # 8 f32, 16 bf16, 32 int8
    row_f32_bytes = max(1, Np * 4)                   # in-kernel f32 copy
    target = (16 << 20) if vmem_cap >= (96 << 20) else (8 << 20)
    cap = max(1, target // row_f32_bytes)

    if cap >= R:
        tr = R                                       # whole slab in one tile
    else:
        tr = max(row_align, (cap // row_align) * row_align)
        # TODO(synk): tile the spatial axis too (second 'arbitrary' grid dim
        # with per-row sum/sumsq scratch) when one row-group exceeds the
        # target tile size (extremely large H*W).

    if R >= 2 * row_align:
        min_steps = 4 if (R >= 8 * row_align and
                          R * row_f32_bytes >= (2 << 20)) else 2
        steps = _cdiv(R, tr)
        if steps < min_steps:
            tr = max(row_align,
                     _cdiv(_cdiv(R, min_steps), row_align) * row_align)
            steps = _cdiv(R, tr)
        if steps % 2 == 1:
            tr2 = max(row_align,
                      _cdiv(_cdiv(R, steps + 1), row_align) * row_align)
            if _cdiv(R, tr2) % 2 == 0:
                tr = tr2
    return min(tr, R)


@jax.jit
def adain(x, gamma, beta):
    """x: (B, C, H, W); gamma, beta: (B, C).  Returns (B, C, H, W)."""
    B, C, H, W = x.shape
    R, N = B * C, H * W

    x2 = x.reshape(R, N)

    # Keep the output lane-dense: pad the spatial axis up to a multiple of
    # 128.  Zero padding is exact for the one-pass sums (see kernel).
    Np = _cdiv(N, 128) * 128
    if Np != N:
        x2 = jnp.pad(x2, ((0, 0), (0, Np - N)))

    # Affine params stay float32 regardless of x.dtype (they are tiny).
    gb = jnp.stack(
        [gamma.reshape(R).astype(jnp.float32),
         beta.reshape(R).astype(jnp.float32)],
        axis=-1,
    )                                                # (R, 2) f32

    itemsize = jnp.dtype(x.dtype).itemsize
    vmem_cap = _vmem_capacity_bytes()
    tr = _choose_tile_rows(R, Np, itemsize, vmem_cap)
    grid = (_cdiv(R, tr),)

    # VMEM budget: double-buffered in + out blocks (storage dtype) plus the
    # in-kernel f32 working copy of the tile, plus headroom; capped safely
    # below this generation's physical VMEM (v7x = 64 MiB is the binding one).
    tile_store = tr * Np * itemsize
    tile_f32 = tr * Np * 4
    need = 4 * tile_store + 2 * tile_f32 + (4 << 20)
    vmem_limit = int(min(vmem_cap - (8 << 20), max(32 << 20, need)))

    out2 = pl.pallas_call(
        functools.partial(_adain_kernel, n_true=N),
        out_shape=jax.ShapeDtypeStruct((R, Np), x.dtype),
        grid_spec=pltpu.PrefetchScalarGridSpec(
            num_scalar_prefetch=0,
            grid=grid,
            in_specs=[
                pl.BlockSpec((tr, Np), lambda i: (i, 0)),   # x row tile
                pl.BlockSpec((tr, 2), lambda i: (i, 0)),    # packed gamma/beta
            ],
            out_specs=pl.BlockSpec((tr, Np), lambda i: (i, 0)),
        ),
        compiler_params=pltpu.CompilerParams(
            dimension_semantics=("parallel",),
            vmem_limit_bytes=vmem_limit,
        ),
    )(x2, gb)

    if Np != N:
        out2 = out2[:, :N]
    return out2.reshape(B, C, H, W)


def _reference(x, gamma, beta):
    # Pure-JAX reference matching the PyTorch module exactly (unbiased std).
    B, C, H, W = x.shape
    xf = x.reshape(B, C, -1).astype(jnp.float32)
    mean = xf.mean(axis=2, keepdims=True)
    var = jnp.sum((xf - mean) ** 2, axis=2, keepdims=True) / (H * W - 1)
    std = jnp.sqrt(var)
    g = gamma.astype(jnp.float32)[:, :, None]
    b = beta.astype(jnp.float32)[:, :, None]
    out = g * (xf - mean) / std + b
    return out.reshape(B, C, H, W).astype(x.dtype)


if __name__ == "__main__":
    key = jax.random.PRNGKey(0)
    kx, kg, kb = jax.random.split(key, 3)

    # Primary small test: (B, C, H, W) = (2, 4, 16, 16).
    B, C, H, W = 2, 4, 16, 16
    x = jax.random.normal(kx, (B, C, H, W), dtype=jnp.float32)
    gamma = jax.random.normal(kg, (B, C), dtype=jnp.float32)
    beta = jax.random.normal(kb, (B, C), dtype=jnp.float32)

    out = adain(x, gamma, beta)
    jax.block_until_ready(out)
    ref = _reference(x, gamma, beta)
    assert out.shape == (B, C, H, W)
    assert jnp.allclose(out, ref, atol=1e-4, rtol=1e-4), (
        f"max abs err = {jnp.max(jnp.abs(out - ref))}"
    )

    # Second shape: exercises a multi-step (even) grid with a partial tail.
    B2, C2, H2, W2 = 4, 5, 16, 16
    xb = jax.random.normal(kx, (B2, C2, H2, W2), dtype=jnp.float32)
    gb_ = jax.random.normal(kg, (B2, C2), dtype=jnp.float32)
    bb = jax.random.normal(kb, (B2, C2), dtype=jnp.float32)
    outb = adain(xb, gb_, bb)
    jax.block_until_ready(outb)
    refb = _reference(xb, gb_, bb)
    assert jnp.allclose(outb, refb, atol=1e-4, rtol=1e-4), (
        f"max abs err = {jnp.max(jnp.abs(outb - refb))}"
    )

    # Third shape: H*W = 100 (not a multiple of 128) exercises the lane-pad
    # path and the padding-free one-pass statistics.
    B3, C3, H3, W3 = 2, 4, 10, 10
    xc = jax.random.normal(kx, (B3, C3, H3, W3), dtype=jnp.float32)
    gc = jax.random.normal(kg, (B3, C3), dtype=jnp.float32)
    bc = jax.random.normal(kb, (B3, C3), dtype=jnp.float32)
    outc = adain(xc, gc, bc)
    jax.block_until_ready(outc)
    refc = _reference(xc, gc, bc)
    assert jnp.allclose(outc, refc, atol=1e-4, rtol=1e-4), (
        f"max abs err = {jnp.max(jnp.abs(outc - refc))}"
    )

    print("KERNEL_OK")
</pallas_src>

<mosaic_0001>
module attributes {stable_mosaic.version = 11 : i64} {
  func.func @_adain_kernel(%arg0: i32, %arg1: memref<8x256xf32, #tpu.memory_space<vmem>>, %arg2: memref<8x2xf32, #tpu.memory_space<vmem>>, %arg3: memref<8x256xf32, #tpu.memory_space<vmem>>) attributes {dimension_semantics = [#tpu.dimension_semantics<parallel>], iteration_bounds = array<i64: 1>, scalar_prefetch = 0 : i64, scratch_operands = 0 : i64, tpu.core_type = #tpu.core_type<tc>, window_params = [{transform_indices = @transform_0, window_bounds = array<i64: 8, 256>}, {transform_indices = @transform_1, window_bounds = array<i64: 8, 2>}, {transform_indices = @transform_2, window_bounds = array<i64: 8, 256>}]} {
    %c0 = arith.constant 0 : index
    %c0_0 = arith.constant 0 : index
    %0 = vector.load %arg1[%c0, %c0_0] : memref<8x256xf32, #tpu.memory_space<vmem>>, vector<8x256xf32>
    %c0_1 = arith.constant 0 : index
    %c0_2 = arith.constant 0 : index
    %1 = vector.load %arg2[%c0_1, %c0_2] : memref<8x2xf32, #tpu.memory_space<vmem>>, vector<8x1xf32>
    %c0_3 = arith.constant 0 : index
    %c1 = arith.constant 1 : index
    %2 = vector.load %arg2[%c0_3, %c1] : memref<8x2xf32, #tpu.memory_space<vmem>>, vector<8x1xf32>
    %cst = arith.constant dense<0.000000e+00> : vector<8xf32>
    %3 = vector.multi_reduction <add>, %0, %cst [1] : vector<8x256xf32> to vector<8xf32>
    %4 = vector.shape_cast %3 : vector<8xf32> to vector<8x1xf32>
    %5 = arith.mulf %0, %0 : vector<8x256xf32>
    %cst_4 = arith.constant dense<0.000000e+00> : vector<8xf32>
    %6 = vector.multi_reduction <add>, %5, %cst_4 [1] : vector<8x256xf32> to vector<8xf32>
    %7 = vector.shape_cast %6 : vector<8xf32> to vector<8x1xf32>
    %cst_5 = arith.constant 3.906250e-03 : f32
    %8 = vector.broadcast %cst_5 : f32 to vector<8x1xf32>
    %9 = arith.mulf %4, %8 : vector<8x1xf32>
    %10 = arith.mulf %4, %9 : vector<8x1xf32>
    %11 = arith.subf %7, %10 : vector<8x1xf32>
    %cst_6 = arith.constant 2.550000e+02 : f32
    %12 = vector.broadcast %cst_6 : f32 to vector<8x1xf32>
    %13 = arith.divf %11, %12 : vector<8x1xf32>
    %14 = math.rsqrt %13 : vector<8x1xf32>
    %15 = arith.mulf %1, %14 : vector<8x1xf32>
    %16 = arith.mulf %9, %15 : vector<8x1xf32>
    %17 = arith.subf %2, %16 : vector<8x1xf32>
    %18 = vector.broadcast %15 : vector<8x1xf32> to vector<8x256xf32>
    %19 = arith.mulf %0, %18 : vector<8x256xf32>
    %20 = vector.broadcast %17 : vector<8x1xf32> to vector<8x256xf32>
    %21 = arith.addf %19, %20 : vector<8x256xf32>
    %c0_7 = arith.constant 0 : index
    %c0_8 = arith.constant 0 : index
    %22 = vector.load %arg3[%c0_7, %c0_8] : memref<8x256xf32, #tpu.memory_space<vmem>>, vector<8x256xf32>
    tpu.vector_store %arg3[%c0_7, %c0_8], %21 {strides = array<i32>} : memref<8x256xf32, #tpu.memory_space<vmem>>, vector<8x256xf32>,
    return
  }
  func.func @transform_0(%arg0: i32) -> (i32, i32) {
    %c0_i32 = arith.constant 0 : i32
    %c0_i32_0 = arith.constant 0 : i32
    return %arg0, %c0_i32 : i32, i32
  }
  func.func @transform_1(%arg0: i32) -> (i32, i32) {
    %c0_i32 = arith.constant 0 : i32
    %c0_i32_0 = arith.constant 0 : i32
    return %arg0, %c0_i32 : i32, i32
  }
  func.func @transform_2(%arg0: i32) -> (i32, i32) {
    %c0_i32 = arith.constant 0 : i32
    %c0_i32_0 = arith.constant 0 : i32
    return %arg0, %c0_i32 : i32, i32
  }
}

</mosaic_0001>

<bundles_post_ra>
// kernel: adain.1
= control target key start
LH: loop header
LB: loop body
LE: loop exit
PB: predicated region body
PF: predicated region fallthrough
CT: control target
= control target key end

     0   :  { %v62_v6 = vmov 0   ;;  %v63_v13 = vmov 1   ;;  %s95_s0 = inlined_call_operand.vmem [shape: f32[8,256], index: 0, kind: input, shape index: {}]   ;;  %s96_s1 = inlined_call_operand.vmem [shape: f32[8,2], index: 1, kind: input, shape index: {}]   ;;  %s97_s2 = inlined_call_operand.vmem [shape: f32[8,256], index: 2, kind: output, shape index: {}]  }
   0x1   :  { %v11_v0 = vld [vmem:[%s95_s0] sm:$0xff]  ;;  %v12_v1 = vld [vmem:[%s95_s0 + $0x8] sm:$0xff]  ;;  %58 = vset.pattern.permute.xlu1 %v62_v6  ;;  %59 = vset.pattern.permute.xlu0 %v63_v13  ;;  %s64_s0 = smov 1  }
   0x2   :  { %v14_v2 = vadd.f32 %v12_v1, %v11_v0  ;;  %v17_v3 = vmul.f32 %v11_v0, %v11_v0  ;;  %v18_v4 = vmul.f32 %v12_v1, %v12_v1  ;;  %v13_v14 = vld [vmem:[%s96_s1] sm:$0xff] }
   0x4   :  { %15 = vadd.xlane.f32.xlu0 %v14_v2  ;;  %v19_v5 = vadd.f32 %v18_v4, %v17_v3 }
   0x8   :  { %20 = vadd.xlane.f32.xlu0 %v19_v5 }
  0x8d   :  { %v16_v7 = vpop.xlane.xlu0 %15 }
  0x8e   :  { %v22_v8 = vmul.f32 0.00390625, %v16_v7 }
  0x90   :  { %v23_v9 = vmul.f32 %v22_v8, %v16_v7 }
  0x91   :  { %v21_v10 = vpop.xlane.xlu0 %20 }
  0x92   :  { %v24_v11 = vsub.f32 %v21_v10, %v23_v9 }
  0x94   :  { %v26_v12 = vmul.f32 0.003921569, %v24_v11 }
  0x96   :  { %60 = vrsqrt.f32 %v26_v12 }
  0xa3   :  { %v61_v15 = vpop.eup %60 }
  0xa4   :  { %v28_v16 = vmul.f32 %v61_v15, %v13_v14 }
  0xa6   :  { %v29_v17 = vmul.f32 %v28_v16, %v22_v8 }
  0xa8   :  { %31 = vrot.lane.b32.xlu1 %v29_v17, %s64_s0 }
  0xac   :  { %37 = vperm.xlu1 %58, %v28_v16  }
 0x11a   :  { %v32_v18 = vpop.permute.xlu1 %31 }
 0x11b   :  { %v34_v19 = vsub.f32 %v13_v14, %v32_v18 }
 0x11d   :  { %44 = vperm.xlu0 %59, %v34_v19  }
 0x127   :  { %v38_v20 = vpop.permute.xlu1 %37 }
 0x128   :  { %v40_v21 = vmul.f32 %v38_v20, %v11_v0  ;;  %v41_v22 = vmul.f32 %v38_v20, %v12_v1 }
 0x198   :  { %v45_v23 = vpop.permute.xlu0 %44 }
 0x199   :  { %v47_v24 = vadd.f32 %v45_v23, %v40_v21  ;;  %v48_v25 = vadd.f32 %v45_v23, %v41_v22 }
 0x19b   :  { %49 = vst [vmem:[%s97_s2] sm:$0xff] %v47_v24  ;;  %50 = vst [vmem:[%s97_s2 + $0x8] sm:$0xff] %v48_v25 }

</bundles_post_ra>
